<compile_context>
chip_gen: v7x
topology: tpu7x:2x2x1
jax: 0.10.0
libtpu: 0.0.40
codegen_flags: <defaults>
</compile_context>

<pallas_src>
import jax
import jax.numpy as jnp
from jax.experimental import pallas as pl
from jax.experimental.pallas import tpu as pltpu


def _round_up(x, m):
    return ((x + m - 1) // m) * m


def _logreg_kernel(x_ref, w_ref, b_ref, o_ref):
    # x_ref: (TILE, W) lane-packed rows   (W = P * D_pad, multiple of 128)
    # w_ref: (W, P)    block-diagonal weights (weights folded in)
    # b_ref: (1,)      bias scalar in SMEM
    # o_ref: (TILE, P) lane-packed outputs
    z = jnp.dot(x_ref[...], w_ref[...], preferred_element_type=jnp.float32)
    z = z + b_ref[0]
    o_ref[...] = jax.nn.sigmoid(z).astype(o_ref.dtype)


def logistic_regression_mpg(x, weight, bias, *, tile_rows=4096):
    """sigmoid(x @ weight.T + bias).

    x: (B, D) float, weight: (1, D) (PyTorch nn.Linear layout), bias: (1,).
    Returns (B, 1) float32.
    """
    B, D = x.shape
    w_flat = weight.reshape(-1)
    b_smem = bias.reshape(1).astype(jnp.float32)
    itemsize = jnp.dtype(x.dtype).itemsize

    # ---- packing geometry ---------------------------------------------------
    if D < 128:
        D_pad = pl.next_power_of_2(D)      # divides 128
        P = 128 // D_pad                   # batch rows packed per 128-lane row
    else:
        # TODO(synk): D >= 128 fallback uses P=1 (narrow output stores plus a
        # feature-pad copy when D % 128 != 0); not exercised for MPG inputs.
        D_pad = _round_up(D, 128)
        P = 1
    W = P * D_pad                          # packed lane width

    # ---- split into a lane-packed main part (kernel) + tiny jnp tail -------
    if D == D_pad:
        Bp = B // P                        # full packed rows, zero copies
        main_B = Bp * P
        x_packed = x[:main_B].reshape(Bp, W) if Bp > 0 else None
        x_tail = x[main_B:]
    else:
        # Feature pad is unavoidable; fold the (< P rows) batch pad into the
        # same single jnp.pad so everything goes through the kernel.
        Bp = pl.cdiv(B, P)
        main_B = B
        xf = jnp.pad(x, ((0, Bp * P - B), (0, D_pad - D)))
        x_packed = xf.reshape(Bp, W)
        x_tail = x[:0]

    # ---- main part via Pallas ------------------------------------------------
    if Bp > 0:
        # Tile size: big blocks (default 4096 rows -> 2 MiB @ f32) to amortize
        # per-step overhead, but balanced across >= 2 tiles so v7x's two
        # TensorCores both get work (no-op on v5e/v6e).
        tile_rows = max(8, (tile_rows // 8) * 8)
        half = _round_up(pl.cdiv(Bp, 2), 8)
        TILE = min(tile_rows, half)
        n_tiles = pl.cdiv(Bp, TILE)

        # Block-diagonal weights: w_block[p*D_pad + d, k] = weight[d] if p == k.
        wf = w_flat.astype(jnp.float32)
        if D_pad != D:
            wf = jnp.pad(wf, (0, D_pad - D))
        eye = jnp.eye(P, dtype=jnp.float32)
        w_block = (eye[:, None, :] * wf[None, :, None]).reshape(W, P)
        w_block = w_block.astype(x.dtype)

        cost = pl.CostEstimate(
            flops=2 * Bp * W * P,
            transcendentals=Bp * P,
            bytes_accessed=Bp * W * itemsize + W * P * itemsize + Bp * P * 4,
        )

        out = pl.pallas_call(
            _logreg_kernel,
            out_shape=jax.ShapeDtypeStruct((Bp, P), jnp.float32),
            grid_spec=pltpu.PrefetchScalarGridSpec(
                num_scalar_prefetch=0,
                grid=(n_tiles,),
                in_specs=[
                    pl.BlockSpec((TILE, W), lambda i: (i, 0)),          # packed x
                    pl.BlockSpec((W, P), lambda i: (0, 0)),             # weights (resident)
                    pl.BlockSpec(memory_space=pltpu.MemorySpace.SMEM),  # bias scalar
                ],
                out_specs=pl.BlockSpec((TILE, P), lambda i: (i, 0)),
            ),
            compiler_params=pltpu.CompilerParams(
                # Independent batch tiles: shard across v7x's 2 TensorCores.
                dimension_semantics=("parallel",),
            ),
            cost_estimate=cost,
        )(x_packed, w_block, b_smem)

        # Packed output row i holds batch rows i*P .. i*P+P-1 in order.
        main_out = out.reshape(-1)[:main_B].reshape(main_B, 1)
    else:
        main_out = jnp.zeros((0, 1), dtype=jnp.float32)

    # ---- tiny (< P rows) tail with plain jnp --------------------------------
    if x_tail.shape[0] > 0:
        tail_out = jax.nn.sigmoid(
            x_tail.astype(jnp.float32) @ weight.T.astype(jnp.float32)
            + bias.astype(jnp.float32)
        )
        return jnp.concatenate([main_out, tail_out], axis=0)
    return main_out


if __name__ == "__main__":
    # Small shapes consistent with the module: batch=8, input_dim=16
    B, D = 8, 16

    key = jax.random.PRNGKey(0)
    kx, kw, kb = jax.random.split(key, 3)

    x = jax.random.normal(kx, (B, D), dtype=jnp.float32)

    # Deterministic init (PyTorch nn.Linear default: U(-1/sqrt(D), 1/sqrt(D)))
    bound = 1.0 / jnp.sqrt(jnp.float32(D))
    weight = jax.random.uniform(kw, (1, D), minval=-bound, maxval=bound,
                                dtype=jnp.float32)
    bias = jax.random.uniform(kb, (1,), minval=-bound, maxval=bound,
                              dtype=jnp.float32)

    out = logistic_regression_mpg(x, weight, bias)
    out = jax.block_until_ready(out)

    ref = jax.nn.sigmoid(x @ weight.T + bias)
    assert out.shape == (B, 1)
    assert jnp.allclose(out, ref, atol=1e-5, rtol=1e-5)

    # Multi-tile path, no tail (B multiple of P), partial last block.
    B2 = 10000
    x2 = jax.random.normal(jax.random.PRNGKey(1), (B2, D), dtype=jnp.float32)
    out2 = jax.block_until_ready(logistic_regression_mpg(x2, weight, bias))
    ref2 = jax.nn.sigmoid(x2 @ weight.T + bias)
    assert out2.shape == (B2, 1)
    assert jnp.allclose(out2, ref2, atol=1e-4, rtol=1e-4)

    # Tail path (B not a multiple of P).
    B3 = 10003
    x3 = jax.random.normal(jax.random.PRNGKey(2), (B3, D), dtype=jnp.float32)
    out3 = jax.block_until_ready(logistic_regression_mpg(x3, weight, bias))
    ref3 = jax.nn.sigmoid(x3 @ weight.T + bias)
    assert out3.shape == (B3, 1)
    assert jnp.allclose(out3, ref3, atol=1e-4, rtol=1e-4)

    # Feature-pad path (D not a power of two), like real MPG feature counts.
    B4, D4 = 1000, 9
    x4 = jax.random.normal(jax.random.PRNGKey(3), (B4, D4), dtype=jnp.float32)
    w4 = jax.random.normal(jax.random.PRNGKey(4), (1, D4), dtype=jnp.float32) * 0.1
    b4 = jax.random.normal(jax.random.PRNGKey(5), (1,), dtype=jnp.float32) * 0.1
    out4 = jax.block_until_ready(logistic_regression_mpg(x4, w4, b4))
    ref4 = jax.nn.sigmoid(x4 @ w4.T + b4)
    assert out4.shape == (B4, 1)
    assert jnp.allclose(out4, ref4, atol=1e-4, rtol=1e-4)

    print("KERNEL_OK")
</pallas_src>

<mosaic_0001>
module attributes {stable_mosaic.version = 11 : i64} {
  func.func @_logreg_kernel(%arg0: i32, %arg1: memref<8x128xf32, #tpu.memory_space<vmem>>, %arg2: memref<128x8xf32, #tpu.memory_space<vmem>>, %arg3: memref<1xf32, #tpu.memory_space<smem>>, %arg4: memref<8x8xf32, #tpu.memory_space<vmem>>) attributes {dimension_semantics = [#tpu.dimension_semantics<parallel>], iteration_bounds = array<i64: 1>, scalar_prefetch = 0 : i64, scratch_operands = 0 : i64, tpu.core_type = #tpu.core_type<tc>, window_params = [{transform_indices = @transform_0, window_bounds = array<i64: 8, 128>}, {pipeline_mode = #tpu.pipeline_mode<synchronous>, transform_indices = @transform_1, window_bounds = array<i64: 128, 8>}, {transform_indices = @transform_2, window_bounds = array<i64: 1>}, {transform_indices = @transform_3, window_bounds = array<i64: 8, 8>}]} {
    %c0 = arith.constant 0 : index
    %c0_0 = arith.constant 0 : index
    %0 = vector.load %arg1[%c0, %c0_0] : memref<8x128xf32, #tpu.memory_space<vmem>>, vector<8x128xf32>
    %c0_1 = arith.constant 0 : index
    %c0_2 = arith.constant 0 : index
    %1 = vector.load %arg2[%c0_1, %c0_2] : memref<128x8xf32, #tpu.memory_space<vmem>>, vector<128x8xf32>
    %cst = arith.constant dense<0.000000e+00> : vector<8x8xf32>
    %2 = tpu.matmul %0, %1, %cst {dimension_numbers = #tpu.dot_dimension_numbers<[1], [0], [0], [1], [0, 0, 1, 1], [], []>} : vector<8x128xf32>, vector<128x8xf32>, vector<8x8xf32> -> vector<8x8xf32>
    %c0_3 = arith.constant 0 : index
    %3 = memref.load %arg3[%c0_3] : memref<1xf32, #tpu.memory_space<smem>>
    %4 = vector.broadcast %3 : f32 to vector<8x8xf32>
    %5 = arith.addf %2, %4 : vector<8x8xf32>
    %6 = arith.negf %5 : vector<8x8xf32>
    %7 = math.exp %6 : vector<8x8xf32>
    %cst_4 = arith.constant 1.000000e+00 : f32
    %8 = vector.broadcast %cst_4 : f32 to vector<8x8xf32>
    %9 = arith.addf %8, %7 : vector<8x8xf32>
    %10 = arith.divf %8, %9 : vector<8x8xf32>
    %c0_5 = arith.constant 0 : index
    %c0_6 = arith.constant 0 : index
    %11 = vector.load %arg4[%c0_5, %c0_6] : memref<8x8xf32, #tpu.memory_space<vmem>>, vector<8x8xf32>
    tpu.vector_store %arg4[%c0_5, %c0_6], %10 {strides = array<i32>} : memref<8x8xf32, #tpu.memory_space<vmem>>, vector<8x8xf32>,
    return
  }
  func.func @transform_0(%arg0: i32) -> (i32, i32) {
    %c0_i32 = arith.constant 0 : i32
    %c0_i32_0 = arith.constant 0 : i32
    return %arg0, %c0_i32 : i32, i32
  }
  func.func @transform_1(%arg0: i32) -> (i32, i32) {
    %c0_i32 = arith.constant 0 : i32
    %c0_i32_0 = arith.constant 0 : i32
    %c0_i32_1 = arith.constant 0 : i32
    return %c0_i32, %c0_i32_0 : i32, i32
  }
  func.func @transform_2(%arg0: i32) -> i32 {
    %c0_i32 = arith.constant 0 : i32
    %c0_i32_0 = arith.constant 0 : i32
    return %c0_i32 : i32
  }
  func.func @transform_3(%arg0: i32) -> (i32, i32) {
    %c0_i32 = arith.constant 0 : i32
    %c0_i32_0 = arith.constant 0 : i32
    return %arg0, %c0_i32 : i32, i32
  }
}

</mosaic_0001>

<bundles_post_ra>
// kernel: tpu_custom_call.1
= control target key start
LH: loop header
LB: loop body
LE: loop exit
PB: predicated region body
PF: predicated region fallthrough
CT: control target
= control target key end

     0   :  { %9 = vsyncpa [#allocation4], 0  ;;  %v240_v2 = vmov 0.0|0.0   ;;  %vm241_vm0 = vmmov 0   ;;  %v242_v6 = vmov 0.0   ;;  %vm111_vm1 = vcmask 64512   ;;  %s332_s0 = inlined_call_operand.vmem [shape: f32[1,128], index: 0, kind: input, shape index: {}]   ;;  %s333_s1 = inlined_call_operand.vmem [shape: f32[128,8], index: 1, kind: input, shape index: {}]   ;;  %s334_s2 = inlined_call_operand.<no memory space> [shape: f32[1], index: 2, kind: input, shape index: {}]   ;;  %s335_s3 = inlined_call_operand.hbm [shape: f32[1,8], index: 3, kind: output, shape index: {}]  }
   0x1   :  { %v17_v0 = vld [vmem:[%s333_s1] sm:$0xff]  ;;  %v18_v1 = vld [vmem:[%s333_s1 + $0x8] sm:$0xff]  ;;  %182 = vmatprep.subr.bf16.mxu0 %v240_v2  ;;  %v19_v4 = vld [vmem:[%s333_s1 + $0x10] sm:$0xff]  ;;  %179 = vmatprep.mubr.msk.f32.mxu0 %vm241_vm0, %v242_v6  ;;  %v34_v27 = vstv %s334_s2 }
   0x2   :  { %v183_v3 = vpack.c.bf16 %v18_v1, %v17_v0  ;;  %v20_v5 = vld [vmem:[%s333_s1 + $0x18] sm:$0xff]  ;;  %v21_v8 = vld [vmem:[%s333_s1 + $0x20] sm:$0xff]  ;;  %v22_v9 = vld [vmem:[%s333_s1 + $0x28] sm:$0xff] }
   0x3   :  { %v186_v7 = vpack.c.bf16 %v20_v5, %v19_v4  ;;  %v189_v10 = vpack.c.bf16 %v22_v9, %v21_v8  ;;  %v23_v11 = vld [vmem:[%s333_s1 + $0x30] sm:$0xff]  ;;  %v24_v12 = vld [vmem:[%s333_s1 + $0x38] sm:$0xff]  ;;  %v25_v14 = vld [vmem:[%s333_s1 + $0x40] sm:$0xff] }
   0x4   :  { %184 = vmatpush3.bf16.msra.mxu0 %v183_v3  ;;  %v192_v13 = vpack.c.bf16 %v24_v12, %v23_v11  ;;  %v26_v15 = vld [vmem:[%s333_s1 + $0x48] sm:$0xff]  ;;  %v27_v17 = vld [vmem:[%s333_s1 + $0x50] sm:$0xff]  ;;  %v28_v18 = vld [vmem:[%s333_s1 + $0x58] sm:$0xff] }
   0x5   :  { %185 = vmatprep.subr.bf16.mxu0 %v240_v2  ;;  %v195_v16 = vpack.c.bf16 %v26_v15, %v25_v14  ;;  %v198_v19 = vpack.c.bf16 %v28_v18, %v27_v17  ;;  %v29_v20 = vld [vmem:[%s333_s1 + $0x60] sm:$0xff]  ;;  %v30_v21 = vld [vmem:[%s333_s1 + $0x68] sm:$0xff]  ;;  %v31_v23 = vld [vmem:[%s333_s1 + $0x70] sm:$0xff] }
   0x6   :  { %v201_v22 = vpack.c.bf16 %v30_v21, %v29_v20  ;;  %v32_v24 = vld [vmem:[%s333_s1 + $0x78] sm:$0xff]  ;;  %v16_v26 = vld [vmem:[%s332_s0] sm:$0xff] }
   0x7   :  { %v204_v25 = vpack.c.bf16 %v32_v24, %v31_v23 }
   0x8   :  { %187 = vmatpush3.bf16.msra.mxu0 %v186_v7 }
   0x9   :  { %188 = vmatprep.subr.bf16.mxu0 %v240_v2 }
   0xc   :  { %190 = vmatpush3.bf16.msra.mxu0 %v189_v10 }
   0xd   :  { %191 = vmatprep.subr.bf16.mxu0 %v240_v2 }
  0x10   :  { %193 = vmatpush3.bf16.msra.mxu0 %v192_v13 }
  0x11   :  { %194 = vmatprep.subr.bf16.mxu0 %v240_v2 }
  0x14   :  { %196 = vmatpush3.bf16.msra.mxu0 %v195_v16 }
  0x15   :  { %197 = vmatprep.subr.bf16.mxu0 %v240_v2 }
  0x18   :  { %199 = vmatpush3.bf16.msra.mxu0 %v198_v19 }
  0x19   :  { %200 = vmatprep.subr.bf16.mxu0 %v240_v2 }
  0x1c   :  { %202 = vmatpush3.bf16.msra.mxu0 %v201_v22 }
  0x1d   :  { %203 = vmatprep.subr.bf16.mxu0 %v240_v2 }
  0x20   :  { %205 = vmatpush3.bf16.msra.mxu0 %v204_v25 }
  0x23   :  { %180 = vmatmul.mubr.f32.vlgmr.msra.gmra.mrb[0].mxu0 %v16_v26 }
  0xf6   :  { %v101_v28 = vpop.f32.mrb[0].mxu0 }
  0xf7   :  { %v102_v29 = vadd.f32 %v101_v28, %v34_v27  ;;  %v181_v30 = vpop.f32.mrb[1].mxu0 }
  0xf9   :  { %v129_v31 = vmul.f32 -1.442695, %v102_v29 }
  0xfb   :  { %212 = vpow2.f32 %v129_v31 }
 0x105   :  { %v213_v32 = vpop.eup %212 }
 0x106   :  { %v108_v33 = vadd.f32 1.0, %v213_v32 }
 0x108   :  { %214 = vrcp.f32 %v108_v33 }
 0x112   :  { %v215_v34 = vpop.eup %214 }
 0x113   :  { %112 = vst.msk [vmem:[#allocation3] sm:$0xff] %vm111_vm1, %v215_v34 }
 0x114   :  { %117 = vsyncadd [#allocation4], 112  ;;  %s243_s1 = smov [#allocation3]  }
 0x115   :  { %s118_s21 = sshll.u32 %s243_s1, 4  ;;  %s119_s21 = int_to_ptr.vmem [resolvable:$true] %s118_s21 }
 0x116   :  { %s216_s0 = scalar_lea.vmem %s119_s21, 16  ;;  %s220_s22 = scalar_lea.vmem %s119_s21, 128 }
 0x117   :  { %p217_p0 = scmp.ne.s32.totalorder %s119_s21, %s216_s0  ;;  %p221_p1 = scmp.lt.s32.totalorder %s119_s21, %s119_s21 }
 0x118   :  { %p222_p2 = scmp.lt.s32.totalorder %s220_s22, %s216_s0 }
 0x11a   :  { %p223_p3 = por %p222_p2, %p221_p1 }
 0x11c   :  { %p224_p4 = pnand %p223_p3, %p217_p0 }
 0x11e   :  { %227 = shalt.err (!%p224_p4)
}
 0x11f   :  { %s228_s24 = scalar_lea.hbm %s335_s3, 16 }
 0x120   :  { %p229_p5 = scmp.ne.s32.totalorder %s335_s3, %s228_s24  ;;  %p232_p6 = scmp.lt.u32.totalorder %s228_s24, %s335_s3 }
 0x122   :  { %p234_p7 = pnand %p232_p6, %p229_p5 }
 0x124   :  { %237 = shalt.err (!%p234_p7)
}
 0x125   :  { %s244_s29 = smov 16   ;;  %s245_s30 = smov 1  }
 0x126   :  { %124 = dma.vmem_to_hbm [thread:$0]  %s119_s21, 16, %s335_s3, [#allocation4], %s244_s29, %s244_s29, %s245_s30  }
 0x127   :  { %238 = dma.done.wait [#allocation4], 128  }
 0x128   :  { %239 = vsyncadd [#allocation4], 4294967168 }
 0x129   :  { %128 = vsyncpa [#allocation4], 1 }

</bundles_post_ra>
